<compile_context>
chip_gen: v5e
topology: v5e:2x2
jax: 0.10.0
libtpu: 0.0.40
codegen_flags: <defaults>
</compile_context>

<pallas_src>
from functools import partial

import jax
import jax.numpy as jnp
from jax.experimental import pallas as pl
from jax.experimental.pallas import tpu as pltpu


# ----------------------------------------------------------------------------
# Generation-aware VMEM budgets
# ----------------------------------------------------------------------------
def _vmem_capacity_bytes():
    try:
        cap = int(pltpu.get_tpu_info().vmem_capacity_bytes)
        if cap > 0:
            return cap
    except Exception:
        pass
    return 64 * 1024 * 1024          # conservative default = v7x per-TensorCore VMEM


def _vmem_budgets():
    cap = _vmem_capacity_bytes()
    # leave headroom for Mosaic internal scratch / double buffers:
    #   v7x (64 MiB)  -> limit 48 MiB, slab budget ~22 MiB
    #   v5e/v6e (128) -> limit 96 MiB, slab budget ~45 MiB
    limit = max(16 << 20, min((cap * 3) // 4, cap - (8 << 20)))
    slab_budget = int(cap * 0.35)
    return int(limit), int(slab_budget)


# ----------------------------------------------------------------------------
# Kernel 1: k-NN (negative pairwise distance + exact top-K), lane-dense output
# ----------------------------------------------------------------------------
def _knn_topk_kernel(xq_ref, xk_ref, sqk_ref, sqq_ref, val_ref, idx_ref, *, K):
    """One (batch, query-tile) step.

    xq_ref:  (TM, D) bf16  query rows of this tile
    xk_ref:  (N,  D) bf16  all keys of this batch element (resident across m)
    sqk_ref: (N,  1) f32   0.5*||k||^2 (hoisted to the wrapper)
    sqq_ref: (1, TM) f32   0.5*||q||^2, lane-dense
    val_ref: (K, TM) f32   top-K neg-distances (queries on lanes)
    idx_ref: (K, TM) i32   top-K key indices (batch-local)
    """
    n_keys = xk_ref.shape[0]
    # (N, D) x (TM, D) contracting D -> (N, TM): keys on sublanes, queries on lanes.
    inner = jax.lax.dot_general(xk_ref[...], xq_ref[...], (((1,), (1,)), ((), ())),
                                preferred_element_type=jnp.float32)        # (N, TM)
    # Ranking score without the per-query term (constant per lane column, so it
    # cannot change the ranking): cur[j, i] = <k_j, q_i> - 0.5||k_j||^2.
    cur = inner - sqk_ref[...]                                             # (N, TM)
    sqq = sqq_ref[...]                                                     # (1, TM)

    key_ids = jax.lax.broadcasted_iota(jnp.int32, (n_keys, 1), 0)          # (N, 1)
    neg_inf = jnp.float32(-jnp.inf)

    val_rows, idx_rows = [], []
    for kk in range(K):                         # K = k*dilation is small & static
        best_val = jnp.max(cur, axis=0, keepdims=True)                     # (1, TM)
        # first-occurrence tie-break (matches torch.topk / lax.top_k)
        cand = jnp.where(cur == best_val, key_ids, n_keys)                 # (N, TM) i32
        best_idx = jnp.min(cand, axis=0, keepdims=True)                    # (1, TM) i32
        # full neg distance only on the (1, TM) winner row (2x scaling is exact)
        val_rows.append(2.0 * (best_val - sqq))
        idx_rows.append(best_idx)
        if kk + 1 < K:                          # mask the winner, reusing `cand`
            cur = jnp.where(cand == best_idx, neg_inf, cur)

    # one full lane-dense store per output instead of K sublane-masked row stores
    val_ref[...] = jnp.concatenate(val_rows, axis=0)
    idx_ref[...] = jnp.concatenate(idx_rows, axis=0)


def _pick_query_tile(n, d, K, slab_budget):
    """TM is the lane width of the (1, TM) norm row and the (K, TM) output blocks,
    so it must be a multiple of 128 (or all of N) and divide N.  Sized against the
    real per-step live set."""
    if n <= 128 or n % 128 != 0:
        return n

    def fits(tm):
        slabs = 5 * n * tm * 4          # inner/cur + cand + compare/select temps
        keys = 2 * n * d * 2            # double-buffered bf16 key slab
        sqk = 2 * n * 128 * 4           # (N, 1) f32, lane-padded, double-buffered
        qrows = 2 * tm * d * 2 + 4 * tm * 4
        outs = 2 * 2 * K * tm * 4
        return slabs + keys + sqk + qrows + outs <= slab_budget

    tm = 128
    while n % (tm * 2) == 0 and tm * 2 <= 2048 and fits(tm * 2):
        tm *= 2
    return tm


def knn_topk_pallas(x_bnd, K):
    """x_bnd: (B, N, D) f32 -> (val (B, K, N) f32, idx (B, K, N) i32), lane-dense."""
    B, N, D = x_bnd.shape
    K = int(K)
    vmem_limit, slab_budget = _vmem_budgets()
    TM = _pick_query_tile(N, D, K, slab_budget)

    # bf16 MXU inputs (native on v5e/v6e/v7x, halves the key-slab DMA); norms stay
    # f32 and are hoisted here so they are not recomputed per query tile.
    x16 = x_bnd.astype(jnp.bfloat16)
    sq_half = 0.5 * jnp.sum(x_bnd * x_bnd, axis=-1)            # (B, N) f32 (exact halving)
    sqk = sq_half[:, :, None]                                  # (B, N, 1): keys, sublane axis
    sqq = sq_half[:, None, :]                                  # (B, 1, N): queries, lane-dense

    kernel = partial(_knn_topk_kernel, K=K)
    flops = 2 * B * N * N * D + 5 * K * B * N * N
    bytes_accessed = 2 * B * N * D * (1 + N // TM) + 8 * B * N + 8 * B * K * N

    val, idx = pl.pallas_call(
        kernel,
        out_shape=(
            jax.ShapeDtypeStruct((B, K, N), jnp.float32),
            jax.ShapeDtypeStruct((B, K, N), jnp.int32),
        ),
        grid_spec=pltpu.PrefetchScalarGridSpec(
            num_scalar_prefetch=0,
            grid=(B, N // TM),
            in_specs=[
                pl.BlockSpec((None, TM, D), lambda b, m: (b, m, 0)),   # query tile (bf16)
                pl.BlockSpec((None, N, D), lambda b, m: (b, 0, 0)),    # all keys (bf16, reused over m)
                pl.BlockSpec((None, N, 1), lambda b, m: (b, 0, 0)),    # 0.5||k||^2 (f32, reused over m)
                pl.BlockSpec((None, 1, TM), lambda b, m: (b, 0, m)),   # 0.5||q||^2 (f32, lane-dense)
            ],
            out_specs=(
                pl.BlockSpec((None, K, TM), lambda b, m: (b, 0, m)),
                pl.BlockSpec((None, K, TM), lambda b, m: (b, 0, m)),
            ),
        ),
        compiler_params=pltpu.CompilerParams(
            dimension_semantics=("parallel", "parallel"),
            vmem_limit_bytes=vmem_limit,
        ),
        cost_estimate=pl.CostEstimate(
            flops=int(flops), transcendentals=0, bytes_accessed=int(bytes_accessed)),
    )(x16, x16, sqk, sqq)
    return val, idx


# ----------------------------------------------------------------------------
# Kernel 2: EdgeConv (mean aggregation) + residual
# ----------------------------------------------------------------------------
def _edgeconv_kernel(x_ref, xj_ref, w12_ref, w2_ref, b_ref, o_ref, *, k, res_scale):
    """mean_j relu([x_i ; x_j - x_i] @ W + b) + res_scale * x_i with
    [x_i ; x_j - x_i] @ W = x_i @ (W1 - W2) + x_j @ W2, so the k neighbor matmuls
    collapse into one (k*TM, C) x (C, C) MXU op.  Epilogue / residual stay f32."""
    xi = x_ref[...]                                            # (TM, C) f32 (exact residual)
    xi16 = xi.astype(jnp.bfloat16)
    w12 = w12_ref[...]                                         # (C, C) bf16 = W1 - W2
    w2 = w2_ref[...]                                           # (C, C) bf16
    bias = b_ref[...]                                          # (1, C) f32
    tm, c = xi.shape

    base = jnp.dot(xi16, w12, preferred_element_type=jnp.float32) + bias   # (TM, C)

    # one big MXU matmul over all k neighbors (sublane concat, no reshape)
    xj_flat = jnp.concatenate([xj_ref[r] for r in range(k)], axis=0)       # (k*TM, C) bf16
    hj = jnp.dot(xj_flat, w2, preferred_element_type=jnp.float32)          # (k*TM, C)

    acc = jnp.zeros((tm, c), jnp.float32)
    for r in range(k):                                         # f32 relu + mean epilogue (VPU)
        acc = acc + jnp.maximum(base + hj[r * tm:(r + 1) * tm, :], 0.0)
    o_ref[...] = (acc * (1.0 / k) + res_scale * xi).astype(o_ref.dtype)


def _pick_node_tile(n, c, k, slab_budget):
    """Largest multiple-of-8 divisor of N whose per-step live set (double-buffered
    bf16 xj block + x/out tiles + f32 matmul & epilogue temps) fits the budget."""
    per_row = max(1, c * (10 * k + 32))
    cands = [d for d in range(8, n + 1, 8) if n % d == 0]
    if not cands:
        return n
    fits = [d for d in cands if d * per_row <= slab_budget]
    return max(fits) if fits else min(cands)


def edge_conv_mean_pallas(x_bnd, xj_bknc, w, b, *, res_scale=1.0):
    """x_bnd (B,N,C) f32, xj_bknc (B,k,N,C) bf16 gathered neighbors, w (2C,C), b (C,)."""
    B, N, C = x_bnd.shape
    k = int(xj_bknc.shape[1])
    vmem_limit, slab_budget = _vmem_budgets()
    TM = _pick_node_tile(N, C, k, slab_budget)

    w = w.astype(jnp.float32)
    w12 = (w[:C] - w[C:]).astype(jnp.bfloat16)     # xi@W1 + (xj-xi)@W2 = xi@(W1-W2) + xj@W2
    w2 = w[C:].astype(jnp.bfloat16)
    b2 = b.reshape(1, C).astype(jnp.float32)

    kernel = partial(_edgeconv_kernel, k=k, res_scale=float(res_scale))
    flops = 2 * B * N * (k + 1) * C * C + 3 * B * N * k * C
    bytes_accessed = 8 * B * N * C + 2 * B * N * k * C + 4 * C * C

    return pl.pallas_call(
        kernel,
        out_shape=jax.ShapeDtypeStruct((B, N, C), jnp.float32),
        grid_spec=pltpu.PrefetchScalarGridSpec(
            num_scalar_prefetch=0,
            grid=(B, N // TM),
            in_specs=[
                pl.BlockSpec((None, TM, C), lambda bb, m: (bb, m, 0)),       # x_i (f32)
                pl.BlockSpec((None, k, TM, C), lambda bb, m: (bb, 0, m, 0)),  # gathered x_j (bf16)
                pl.BlockSpec((C, C), lambda bb, m: (0, 0)),                  # W1 - W2 (bf16)
                pl.BlockSpec((C, C), lambda bb, m: (0, 0)),                  # W2 (bf16)
                pl.BlockSpec((1, C), lambda bb, m: (0, 0)),                  # bias (f32)
            ],
            out_specs=pl.BlockSpec((None, TM, C), lambda bb, m: (bb, m, 0)),
        ),
        compiler_params=pltpu.CompilerParams(
            dimension_semantics=("parallel", "parallel"),
            vmem_limit_bytes=vmem_limit,
        ),
        cost_estimate=pl.CostEstimate(
            flops=int(flops), transcendentals=0, bytes_accessed=int(bytes_accessed)),
    )(x_bnd, xj_bknc, w12, w2, b2)


# ----------------------------------------------------------------------------
# Module-level wrappers (mirroring the PyTorch forward, eval mode)
# ----------------------------------------------------------------------------
def _knn_edges(x, *, k, dilation, num_batches):
    B = int(num_batches)
    BN, D = x.shape
    if BN % B != 0:
        raise ValueError("x rows must be divisible by num_batches")
    N = BN // B
    K = k * dilation
    if K > N:
        raise ValueError(f"k*dilation={K} must be <= points per cloud N={N}")

    x_bnd = x.reshape(B, N, D).astype(jnp.float32)
    val_kn, idx_kn = knn_topk_pallas(x_bnd, K)                 # (B, K, N) lane-dense

    # (B, N, K) ordering only where the flattened edge lists need it
    nn_local = jnp.transpose(idx_kn, (0, 2, 1))                # (B, N, K)
    val = jnp.transpose(val_kn, (0, 2, 1))                     # (B, N, K)

    start = (jnp.arange(B, dtype=jnp.int32) * N)[:, None, None]
    nn_flat = (nn_local + start).reshape(1, -1)
    center = jnp.repeat(jnp.arange(B * N, dtype=jnp.int32), K).reshape(1, -1)
    edge_index_full = jnp.concatenate([nn_flat, center], axis=0)   # (2, B*N*K)
    edge_attr = val.reshape(1, -1)                                 # (1, B*N*K)
    # Dilated(stochastic=False): only edge_index is subsampled; edge_attr keeps
    # all K entries (this asymmetry matches the PyTorch branch exactly).
    edge_index = edge_index_full[:, ::dilation]                    # (2, B*N*k)
    return edge_index, edge_attr, idx_kn, x_bnd


def dilated_knn_graph(x, batch=None, *, k=9, dilation=1, num_batches=None):
    """DilatedKnnGraph.forward (stochastic=False)."""
    if num_batches is None:
        # fallback mirrors torch's batch[-1]+1 but forces a device->host sync
        num_batches = (int(batch[-1]) + 1) if batch is not None else 1
    edge_index, edge_attr, _, _ = _knn_edges(
        x, k=k, dilation=dilation, num_batches=num_batches)
    return edge_index, edge_attr


def res_dyn_block(x, batch, w, b, *, k=9, dilation=1, num_batches=None, res_scale=1.0):
    """ResDynBlock.forward (eval mode): (out (B*N,C), edge_index (2,B*N*k), batch)."""
    if num_batches is None:
        num_batches = (int(batch[-1]) + 1) if batch is not None else 1
    B = int(num_batches)
    BN, C = x.shape
    edge_index, _, idx_kn, x_bnd = _knn_edges(
        x, k=k, dilation=dilation, num_batches=B)
    # TODO(synk): dropout_adj(p=0.2) and the stochastic randperm Dilated branch are
    # training-time randomness; the eval forward used here is the identity on edges.
    nn_dil_kn = idx_kn[:, ::dilation, :]                           # (B, k, N) local ids
    x16 = x_bnd.astype(jnp.bfloat16)
    bidx = jnp.arange(B, dtype=jnp.int32)[:, None, None]
    xj16 = x16[bidx, nn_dil_kn]                                    # (B, k, N, C) bf16 gather
    out = edge_conv_mean_pallas(x_bnd, xj16, w, b, res_scale=res_scale)
    return out.reshape(BN, C), edge_index, batch


# ----------------------------------------------------------------------------
# Pure-JAX reference (for the sanity check).  Uses the same bf16 MXU rounding for
# the kNN inner product as the kernel (so neighbor selection is comparable); the
# EdgeConv math is kept in f32 and checked with a bf16-appropriate tolerance.
# ----------------------------------------------------------------------------
def _reference_res_dyn_block(x, batch, w, b, k, dilation, res_scale):
    B = int(batch[-1]) + 1
    N = x.shape[0] // B
    C = x.shape[-1]
    K = k * dilation
    xb = x.reshape(B, N, C).astype(jnp.float32)
    xb16 = xb.astype(jnp.bfloat16)
    inner = jnp.einsum("bnd,bmd->bnm", xb16, xb16,
                       preferred_element_type=jnp.float32)         # (B, N, N)
    sq = jnp.sum(xb * xb, axis=-1)                                 # (B, N) f32
    neg_adj = 2.0 * inner - sq[:, None, :] - sq[:, :, None]
    val, nn_idx = jax.lax.top_k(neg_adj, K)
    nn_global = nn_idx + (jnp.arange(B) * N)[:, None, None]
    edge_index = jnp.concatenate(
        [nn_global.reshape(1, -1),
         jnp.repeat(jnp.arange(B * N), K).reshape(1, -1)], axis=0)[:, ::dilation]
    edge_attr = val.reshape(1, -1)
    # EdgeConv (mean aggr) + residual on the dilated neighbors, f32
    nn_dil = nn_idx[:, :, ::dilation]                              # (B, N, k)
    bidx = jnp.arange(B)[:, None, None]
    xj = xb[bidx, nn_dil]                                          # (B, N, k, C)
    xi = jnp.broadcast_to(xb[:, :, None, :], xj.shape)
    e = jnp.concatenate([xi, xj - xi], axis=-1)
    h = jax.nn.relu(e @ w.astype(jnp.float32) + b.astype(jnp.float32))
    out = h.mean(axis=2) + res_scale * xb
    return out.reshape(B * N, C), edge_index, edge_attr


if __name__ == "__main__":
    # ResDynBlock-consistent toy shapes: B=2 clouds, N=16 points, channels=4
    B, N, C = 2, 16, 4
    k, dilation = 4, 2
    res_scale = 1.0

    key = jax.random.PRNGKey(0)
    kx, kw, kb = jax.random.split(key, 3)
    x = jax.random.normal(kx, (B * N, C), dtype=jnp.float32)
    batch = jnp.repeat(jnp.arange(B, dtype=jnp.int32), N)
    w = 0.2 * jax.random.normal(kw, (2 * C, C), dtype=jnp.float32)   # edge-MLP Linear(2C -> C)
    b = 0.1 * jax.random.normal(kb, (C,), dtype=jnp.float32)

    out, edge_index, _ = res_dyn_block(
        x, batch, w, b, k=k, dilation=dilation, num_batches=B, res_scale=res_scale)
    out = jax.block_until_ready(out)
    edge_index = jax.block_until_ready(edge_index)

    ei2, ea2 = dilated_knn_graph(x, batch, k=k, dilation=dilation, num_batches=B)
    ea2 = jax.block_until_ready(ea2)

    ref_out, ref_ei, ref_attr = _reference_res_dyn_block(x, batch, w, b, k, dilation, res_scale)

    assert out.shape == (B * N, C)
    assert edge_index.shape == (2, B * N * k)
    assert ea2.shape == (1, B * N * k * dilation)      # PyTorch keeps edge_attr un-dilated
    assert bool(jnp.all(edge_index == ref_ei))
    assert bool(jnp.all(ei2 == ref_ei))
    assert jnp.allclose(ea2, ref_attr, atol=1e-3, rtol=1e-4)
    # bf16 MXU inputs in the kernels vs f32 EdgeConv reference -> bf16-level tolerance
    assert jnp.allclose(out, ref_out, atol=3e-2, rtol=3e-2)

    print("KERNEL_OK")
</pallas_src>

<mosaic_0001>
module attributes {stable_mosaic.version = 11 : i64} {
  func.func @_knn_topk_kernel(%arg0: i32, %arg1: i32, %arg2: memref<1x16x4xbf16, #tpu.memory_space<vmem>>, %arg3: memref<1x16x4xbf16, #tpu.memory_space<vmem>>, %arg4: memref<1x16x1xf32, #tpu.memory_space<vmem>>, %arg5: memref<1x1x16xf32, #tpu.memory_space<vmem>>, %arg6: memref<1x8x16xf32, #tpu.memory_space<vmem>>, %arg7: memref<1x8x16xi32, #tpu.memory_space<vmem>>) attributes {dimension_semantics = [#tpu.dimension_semantics<parallel>, #tpu.dimension_semantics<parallel>], iteration_bounds = array<i64: 2, 1>, scalar_prefetch = 0 : i64, scratch_operands = 0 : i64, tpu.core_type = #tpu.core_type<tc>, window_params = [{transform_indices = @transform_0, window_bounds = array<i64: 1, 16, 4>}, {transform_indices = @transform_1, window_bounds = array<i64: 1, 16, 4>}, {transform_indices = @transform_2, window_bounds = array<i64: 1, 16, 1>}, {transform_indices = @transform_3, window_bounds = array<i64: 1, 1, 16>}, {transform_indices = @transform_4, window_bounds = array<i64: 1, 8, 16>}, {transform_indices = @transform_5, window_bounds = array<i64: 1, 8, 16>}]} {
    %c0 = arith.constant 0 : index
    %c0_0 = arith.constant 0 : index
    %c0_1 = arith.constant 0 : index
    %0 = vector.load %arg3[%c0, %c0_0, %c0_1] : memref<1x16x4xbf16, #tpu.memory_space<vmem>>, vector<1x16x4xbf16>
    %1 = vector.shape_cast %0 : vector<1x16x4xbf16> to vector<16x4xbf16>
    %c0_2 = arith.constant 0 : index
    %c0_3 = arith.constant 0 : index
    %c0_4 = arith.constant 0 : index
    %2 = vector.load %arg2[%c0_2, %c0_3, %c0_4] : memref<1x16x4xbf16, #tpu.memory_space<vmem>>, vector<1x16x4xbf16>
    %3 = vector.shape_cast %2 : vector<1x16x4xbf16> to vector<16x4xbf16>
    %cst = arith.constant dense<0.000000e+00> : vector<16x16xf32>
    %4 = tpu.matmul %1, %3, %cst {dimension_numbers = #tpu.dot_dimension_numbers<[1], [1], [0], [0], [0, 0, 1, 0], [], []>} : vector<16x4xbf16>, vector<16x4xbf16>, vector<16x16xf32> -> vector<16x16xf32>
    %c0_5 = arith.constant 0 : index
    %c0_6 = arith.constant 0 : index
    %c0_7 = arith.constant 0 : index
    %5 = vector.load %arg4[%c0_5, %c0_6, %c0_7] : memref<1x16x1xf32, #tpu.memory_space<vmem>>, vector<1x16x1xf32>
    %6 = vector.shape_cast %5 : vector<1x16x1xf32> to vector<16x1xf32>
    %7 = vector.broadcast %6 : vector<16x1xf32> to vector<16x16xf32>
    %8 = arith.subf %4, %7 : vector<16x16xf32>
    %c0_8 = arith.constant 0 : index
    %c0_9 = arith.constant 0 : index
    %c0_10 = arith.constant 0 : index
    %9 = vector.load %arg5[%c0_8, %c0_9, %c0_10] : memref<1x1x16xf32, #tpu.memory_space<vmem>>, vector<1x1x16xf32>
    %10 = vector.shape_cast %9 : vector<1x1x16xf32> to vector<1x16xf32>
    %11 = tpu.iota {dimensions = array<i32: 0>} : vector<16x1xi32>
    %cst_11 = arith.constant dense<0xFF800000> : vector<16xf32>
    %12 = vector.multi_reduction <maximumf>, %8, %cst_11 [0] : vector<16x16xf32> to vector<16xf32>
    %13 = vector.shape_cast %12 : vector<16xf32> to vector<1x16xf32>
    %14 = vector.broadcast %13 : vector<1x16xf32> to vector<16x16xf32>
    %15 = arith.cmpf oeq, %8, %14 : vector<16x16xf32>
    %c16_i32 = arith.constant 16 : i32
    %16 = vector.shape_cast %11 : vector<16x1xi32> to vector<16x1xi32>
    %17 = vector.broadcast %16 : vector<16x1xi32> to vector<16x16xi32>
    %18 = vector.broadcast %c16_i32 : i32 to vector<16x16xi32>
    %19 = arith.select %15, %17, %18 : vector<16x16xi1>, vector<16x16xi32>
    %cst_12 = arith.constant dense<2147483647> : vector<16xi32>
    %20 = vector.multi_reduction <minsi>, %19, %cst_12 [0] : vector<16x16xi32> to vector<16xi32>
    %21 = vector.shape_cast %20 : vector<16xi32> to vector<1x16xi32>
    %22 = arith.subf %13, %10 : vector<1x16xf32>
    %cst_13 = arith.constant 2.000000e+00 : f32
    %23 = vector.broadcast %cst_13 : f32 to vector<1x16xf32>
    %24 = arith.mulf %23, %22 : vector<1x16xf32>
    %25 = vector.broadcast %21 : vector<1x16xi32> to vector<16x16xi32>
    %26 = arith.cmpi eq, %19, %25 : vector<16x16xi32>
    %cst_14 = arith.constant 0xFF800000 : f32
    %27 = vector.broadcast %cst_14 : f32 to vector<16x16xf32>
    %28 = arith.select %26, %27, %8 : vector<16x16xi1>, vector<16x16xf32>
    %cst_15 = arith.constant dense<0xFF800000> : vector<16xf32>
    %29 = vector.multi_reduction <maximumf>, %28, %cst_15 [0] : vector<16x16xf32> to vector<16xf32>
    %30 = vector.shape_cast %29 : vector<16xf32> to vector<1x16xf32>
    %31 = vector.broadcast %30 : vector<1x16xf32> to vector<16x16xf32>
    %32 = arith.cmpf oeq, %28, %31 : vector<16x16xf32>
    %c16_i32_16 = arith.constant 16 : i32
    %33 = vector.shape_cast %11 : vector<16x1xi32> to vector<16x1xi32>
    %34 = vector.broadcast %33 : vector<16x1xi32> to vector<16x16xi32>
    %35 = vector.broadcast %c16_i32_16 : i32 to vector<16x16xi32>
    %36 = arith.select %32, %34, %35 : vector<16x16xi1>, vector<16x16xi32>
    %cst_17 = arith.constant dense<2147483647> : vector<16xi32>
    %37 = vector.multi_reduction <minsi>, %36, %cst_17 [0] : vector<16x16xi32> to vector<16xi32>
    %38 = vector.shape_cast %37 : vector<16xi32> to vector<1x16xi32>
    %39 = arith.subf %30, %10 : vector<1x16xf32>
    %cst_18 = arith.constant 2.000000e+00 : f32
    %40 = vector.broadcast %cst_18 : f32 to vector<1x16xf32>
    %41 = arith.mulf %40, %39 : vector<1x16xf32>
    %42 = vector.broadcast %38 : vector<1x16xi32> to vector<16x16xi32>
    %43 = arith.cmpi eq, %36, %42 : vector<16x16xi32>
    %cst_19 = arith.constant 0xFF800000 : f32
    %44 = vector.broadcast %cst_19 : f32 to vector<16x16xf32>
    %45 = arith.select %43, %44, %28 : vector<16x16xi1>, vector<16x16xf32>
    %cst_20 = arith.constant dense<0xFF800000> : vector<16xf32>
    %46 = vector.multi_reduction <maximumf>, %45, %cst_20 [0] : vector<16x16xf32> to vector<16xf32>
    %47 = vector.shape_cast %46 : vector<16xf32> to vector<1x16xf32>
    %48 = vector.broadcast %47 : vector<1x16xf32> to vector<16x16xf32>
    %49 = arith.cmpf oeq, %45, %48 : vector<16x16xf32>
    %c16_i32_21 = arith.constant 16 : i32
    %50 = vector.shape_cast %11 : vector<16x1xi32> to vector<16x1xi32>
    %51 = vector.broadcast %50 : vector<16x1xi32> to vector<16x16xi32>
    %52 = vector.broadcast %c16_i32_21 : i32 to vector<16x16xi32>
    %53 = arith.select %49, %51, %52 : vector<16x16xi1>, vector<16x16xi32>
    %cst_22 = arith.constant dense<2147483647> : vector<16xi32>
    %54 = vector.multi_reduction <minsi>, %53, %cst_22 [0] : vector<16x16xi32> to vector<16xi32>
    %55 = vector.shape_cast %54 : vector<16xi32> to vector<1x16xi32>
    %56 = arith.subf %47, %10 : vector<1x16xf32>
    %cst_23 = arith.constant 2.000000e+00 : f32
    %57 = vector.broadcast %cst_23 : f32 to vector<1x16xf32>
    %58 = arith.mulf %57, %56 : vector<1x16xf32>
    %59 = vector.broadcast %55 : vector<1x16xi32> to vector<16x16xi32>
    %60 = arith.cmpi eq, %53, %59 : vector<16x16xi32>
    %cst_24 = arith.constant 0xFF800000 : f32
    %61 = vector.broadcast %cst_24 : f32 to vector<16x16xf32>
    %62 = arith.select %60, %61, %45 : vector<16x16xi1>, vector<16x16xf32>
    %cst_25 = arith.constant dense<0xFF800000> : vector<16xf32>
    %63 = vector.multi_reduction <maximumf>, %62, %cst_25 [0] : vector<16x16xf32> to vector<16xf32>
    %64 = vector.shape_cast %63 : vector<16xf32> to vector<1x16xf32>
    %65 = vector.broadcast %64 : vector<1x16xf32> to vector<16x16xf32>
    %66 = arith.cmpf oeq, %62, %65 : vector<16x16xf32>
    %c16_i32_26 = arith.constant 16 : i32
    %67 = vector.shape_cast %11 : vector<16x1xi32> to vector<16x1xi32>
    %68 = vector.broadcast %67 : vector<16x1xi32> to vector<16x16xi32>
    %69 = vector.broadcast %c16_i32_26 : i32 to vector<16x16xi32>
    %70 = arith.select %66, %68, %69 : vector<16x16xi1>, vector<16x16xi32>
    %cst_27 = arith.constant dense<2147483647> : vector<16xi32>
    %71 = vector.multi_reduction <minsi>, %70, %cst_27 [0] : vector<16x16xi32> to vector<16xi32>
    %72 = vector.shape_cast %71 : vector<16xi32> to vector<1x16xi32>
    %73 = arith.subf %64, %10 : vector<1x16xf32>
    %cst_28 = arith.constant 2.000000e+00 : f32
    %74 = vector.broadcast %cst_28 : f32 to vector<1x16xf32>
    %75 = arith.mulf %74, %73 : vector<1x16xf32>
    %76 = vector.broadcast %72 : vector<1x16xi32> to vector<16x16xi32>
    %77 = arith.cmpi eq, %70, %76 : vector<16x16xi32>
    %cst_29 = arith.constant 0xFF800000 : f32
    %78 = vector.broadcast %cst_29 : f32 to vector<16x16xf32>
    %79 = arith.select %77, %78, %62 : vector<16x16xi1>, vector<16x16xf32>
    %cst_30 = arith.constant dense<0xFF800000> : vector<16xf32>
    %80 = vector.multi_reduction <maximumf>, %79, %cst_30 [0] : vector<16x16xf32> to vector<16xf32>
    %81 = vector.shape_cast %80 : vector<16xf32> to vector<1x16xf32>
    %82 = vector.broadcast %81 : vector<1x16xf32> to vector<16x16xf32>
    %83 = arith.cmpf oeq, %79, %82 : vector<16x16xf32>
    %c16_i32_31 = arith.constant 16 : i32
    %84 = vector.shape_cast %11 : vector<16x1xi32> to vector<16x1xi32>
    %85 = vector.broadcast %84 : vector<16x1xi32> to vector<16x16xi32>
    %86 = vector.broadcast %c16_i32_31 : i32 to vector<16x16xi32>
    %87 = arith.select %83, %85, %86 : vector<16x16xi1>, vector<16x16xi32>
    %cst_32 = arith.constant dense<2147483647> : vector<16xi32>
    %88 = vector.multi_reduction <minsi>, %87, %cst_32 [0] : vector<16x16xi32> to vector<16xi32>
    %89 = vector.shape_cast %88 : vector<16xi32> to vector<1x16xi32>
    %90 = arith.subf %81, %10 : vector<1x16xf32>
    %cst_33 = arith.constant 2.000000e+00 : f32
    %91 = vector.broadcast %cst_33 : f32 to vector<1x16xf32>
    %92 = arith.mulf %91, %90 : vector<1x16xf32>
    %93 = vector.broadcast %89 : vector<1x16xi32> to vector<16x16xi32>
    %94 = arith.cmpi eq, %87, %93 : vector<16x16xi32>
    %cst_34 = arith.constant 0xFF800000 : f32
    %95 = vector.broadcast %cst_34 : f32 to vector<16x16xf32>
    %96 = arith.select %94, %95, %79 : vector<16x16xi1>, vector<16x16xf32>
    %cst_35 = arith.constant dense<0xFF800000> : vector<16xf32>
    %97 = vector.multi_reduction <maximumf>, %96, %cst_35 [0] : vector<16x16xf32> to vector<16xf32>
    %98 = vector.shape_cast %97 : vector<16xf32> to vector<1x16xf32>
    %99 = vector.broadcast %98 : vector<1x16xf32> to vector<16x16xf32>
    %100 = arith.cmpf oeq, %96, %99 : vector<16x16xf32>
    %c16_i32_36 = arith.constant 16 : i32
    %101 = vector.shape_cast %11 : vector<16x1xi32> to vector<16x1xi32>
    %102 = vector.broadcast %101 : vector<16x1xi32> to vector<16x16xi32>
    %103 = vector.broadcast %c16_i32_36 : i32 to vector<16x16xi32>
    %104 = arith.select %100, %102, %103 : vector<16x16xi1>, vector<16x16xi32>
    %cst_37 = arith.constant dense<2147483647> : vector<16xi32>
    %105 = vector.multi_reduction <minsi>, %104, %cst_37 [0] : vector<16x16xi32> to vector<16xi32>
    %106 = vector.shape_cast %105 : vector<16xi32> to vector<1x16xi32>
    %107 = arith.subf %98, %10 : vector<1x16xf32>
    %cst_38 = arith.constant 2.000000e+00 : f32
    %108 = vector.broadcast %cst_38 : f32 to vector<1x16xf32>
    %109 = arith.mulf %108, %107 : vector<1x16xf32>
    %110 = vector.broadcast %106 : vector<1x16xi32> to vector<16x16xi32>
    %111 = arith.cmpi eq, %104, %110 : vector<16x16xi32>
    %cst_39 = arith.constant 0xFF800000 : f32
    %112 = vector.broadcast %cst_39 : f32 to vector<16x16xf32>
    %113 = arith.select %111, %112, %96 : vector<16x16xi1>, vector<16x16xf32>
    %cst_40 = arith.constant dense<0xFF800000> : vector<16xf32>
    %114 = vector.multi_reduction <maximumf>, %113, %cst_40 [0] : vector<16x16xf32> to vector<16xf32>
    %115 = vector.shape_cast %114 : vector<16xf32> to vector<1x16xf32>
    %116 = vector.broadcast %115 : vector<1x16xf32> to vector<16x16xf32>
    %117 = arith.cmpf oeq, %113, %116 : vector<16x16xf32>
    %c16_i32_41 = arith.constant 16 : i32
    %118 = vector.shape_cast %11 : vector<16x1xi32> to vector<16x1xi32>
    %119 = vector.broadcast %118 : vector<16x1xi32> to vector<16x16xi32>
    %120 = vector.broadcast %c16_i32_41 : i32 to vector<16x16xi32>
    %121 = arith.select %117, %119, %120 : vector<16x16xi1>, vector<16x16xi32>
    %cst_42 = arith.constant dense<2147483647> : vector<16xi32>
    %122 = vector.multi_reduction <minsi>, %121, %cst_42 [0] : vector<16x16xi32> to vector<16xi32>
    %123 = vector.shape_cast %122 : vector<16xi32> to vector<1x16xi32>
    %124 = arith.subf %115, %10 : vector<1x16xf32>
    %cst_43 = arith.constant 2.000000e+00 : f32
    %125 = vector.broadcast %cst_43 : f32 to vector<1x16xf32>
    %126 = arith.mulf %125, %124 : vector<1x16xf32>
    %127 = vector.broadcast %123 : vector<1x16xi32> to vector<16x16xi32>
    %128 = arith.cmpi eq, %121, %127 : vector<16x16xi32>
    %cst_44 = arith.constant 0xFF800000 : f32
    %129 = vector.broadcast %cst_44 : f32 to vector<16x16xf32>
    %130 = arith.select %128, %129, %113 : vector<16x16xi1>, vector<16x16xf32>
    %cst_45 = arith.constant dense<0xFF800000> : vector<16xf32>
    %131 = vector.multi_reduction <maximumf>, %130, %cst_45 [0] : vector<16x16xf32> to vector<16xf32>
    %132 = vector.shape_cast %131 : vector<16xf32> to vector<1x16xf32>
    %133 = vector.broadcast %132 : vector<1x16xf32> to vector<16x16xf32>
    %134 = arith.cmpf oeq, %130, %133 : vector<16x16xf32>
    %c16_i32_46 = arith.constant 16 : i32
    %135 = vector.shape_cast %11 : vector<16x1xi32> to vector<16x1xi32>
    %136 = vector.broadcast %135 : vector<16x1xi32> to vector<16x16xi32>
    %137 = vector.broadcast %c16_i32_46 : i32 to vector<16x16xi32>
    %138 = arith.select %134, %136, %137 : vector<16x16xi1>, vector<16x16xi32>
    %cst_47 = arith.constant dense<2147483647> : vector<16xi32>
    %139 = vector.multi_reduction <minsi>, %138, %cst_47 [0] : vector<16x16xi32> to vector<16xi32>
    %140 = vector.shape_cast %139 : vector<16xi32> to vector<1x16xi32>
    %141 = arith.subf %132, %10 : vector<1x16xf32>
    %cst_48 = arith.constant 2.000000e+00 : f32
    %142 = vector.broadcast %cst_48 : f32 to vector<1x16xf32>
    %143 = arith.mulf %142, %141 : vector<1x16xf32>
    %144 = tpu.concatenate %24, %41, %58, %75, %92, %109, %126, %143 in 0 : vector<1x16xf32>, vector<1x16xf32>, vector<1x16xf32>, vector<1x16xf32>, vector<1x16xf32>, vector<1x16xf32>, vector<1x16xf32>, vector<1x16xf32> -> vector<8x16xf32>
    %c0_49 = arith.constant 0 : index
    %c0_50 = arith.constant 0 : index
    %c0_51 = arith.constant 0 : index
    %145 = vector.load %arg6[%c0_49, %c0_50, %c0_51] : memref<1x8x16xf32, #tpu.memory_space<vmem>>, vector<1x8x16xf32>
    %146 = vector.shape_cast %145 : vector<1x8x16xf32> to vector<8x16xf32>
    %147 = vector.shape_cast %144 : vector<8x16xf32> to vector<1x8x16xf32>
    tpu.vector_store %arg6[%c0_49, %c0_50, %c0_51], %147 {strides = array<i32>} : memref<1x8x16xf32, #tpu.memory_space<vmem>>, vector<1x8x16xf32>,
    %148 = tpu.concatenate %21, %38, %55, %72, %89, %106, %123, %140 in 0 : vector<1x16xi32>, vector<1x16xi32>, vector<1x16xi32>, vector<1x16xi32>, vector<1x16xi32>, vector<1x16xi32>, vector<1x16xi32>, vector<1x16xi32> -> vector<8x16xi32>
    %c0_52 = arith.constant 0 : index
    %c0_53 = arith.constant 0 : index
    %c0_54 = arith.constant 0 : index
    %149 = vector.load %arg7[%c0_52, %c0_53, %c0_54] : memref<1x8x16xi32, #tpu.memory_space<vmem>>, vector<1x8x16xi32>
    %150 = vector.shape_cast %149 : vector<1x8x16xi32> to vector<8x16xi32>
    %151 = vector.shape_cast %148 : vector<8x16xi32> to vector<1x8x16xi32>
    tpu.vector_store %arg7[%c0_52, %c0_53, %c0_54], %151 {strides = array<i32>} : memref<1x8x16xi32, #tpu.memory_space<vmem>>, vector<1x8x16xi32>,
    return
  }
  func.func @transform_0(%arg0: i32, %arg1: i32) -> (i32, i32, i32) {
    %c0_i32 = arith.constant 0 : i32
    %c0_i32_0 = arith.constant 0 : i32
    return %arg0, %arg1, %c0_i32 : i32, i32, i32
  }
  func.func @transform_1(%arg0: i32, %arg1: i32) -> (i32, i32, i32) {
    %c0_i32 = arith.constant 0 : i32
    %c0_i32_0 = arith.constant 0 : i32
    %c0_i32_1 = arith.constant 0 : i32
    return %arg0, %c0_i32, %c0_i32_0 : i32, i32, i32
  }
  func.func @transform_2(%arg0: i32, %arg1: i32) -> (i32, i32, i32) {
    %c0_i32 = arith.constant 0 : i32
    %c0_i32_0 = arith.constant 0 : i32
    %c0_i32_1 = arith.constant 0 : i32
    return %arg0, %c0_i32, %c0_i32_0 : i32, i32, i32
  }
  func.func @transform_3(%arg0: i32, %arg1: i32) -> (i32, i32, i32) {
    %c0_i32 = arith.constant 0 : i32
    %c0_i32_0 = arith.constant 0 : i32
    return %arg0, %c0_i32, %arg1 : i32, i32, i32
  }
  func.func @transform_4(%arg0: i32, %arg1: i32) -> (i32, i32, i32) {
    %c0_i32 = arith.constant 0 : i32
    %c0_i32_0 = arith.constant 0 : i32
    return %arg0, %c0_i32, %arg1 : i32, i32, i32
  }
  func.func @transform_5(%arg0: i32, %arg1: i32) -> (i32, i32, i32) {
    %c0_i32 = arith.constant 0 : i32
    %c0_i32_0 = arith.constant 0 : i32
    return %arg0, %c0_i32, %arg1 : i32, i32, i32
  }
}

</mosaic_0001>

<bundles_post_ra>
// kernel: tpu_custom_call.1
= control target key start
LH: loop header
LB: loop body
LE: loop exit
PB: predicated region body
PF: predicated region fallthrough
CT: control target
= control target key end

     0   :  { %11 = vsyncpa [#allocation3], 0  ;;  %s1317_s0 = inlined_call_operand.vmem [shape: bf16[2,16,4], index: 0, kind: input, shape index: {}]   ;;  %s1318_s1 = inlined_call_operand.vmem [shape: bf16[2,16,4], index: 1, kind: input, shape index: {}]   ;;  %s1319_s2 = inlined_call_operand.vmem [shape: f32[2,16,1], index: 2, kind: input, shape index: {}]   ;;  %s1320_s3 = inlined_call_operand.vmem [shape: f32[2,1,16], index: 3, kind: input, shape index: {}]   ;;  %s1321_s4 = inlined_call_operand.hbm [shape: f32[2,8,16], index: 4, kind: output, shape index: {0}]   ;;  %s1322_s5 = inlined_call_operand.hbm [shape: s32[2,8,16], index: 5, kind: output, shape index: {1}]  }
   0x1   :  { %13 = vsyncpa [#allocation3 + $0x1], 0 }
   0x2   :  { %14 = vsyncpa [#allocation5], 0 }
   0x3   :  { %16 = vsyncpa [#allocation5 + $0x1], 0  ;;  %s1101_s18 = smov 0   ;;  %s1103_s19 = smov 0  }
   0x4   :  { %s1105_s20 = smov 0   ;;  %s1107_s21 = smov 0  }
   0x5   :  { %s1109_s22 = smov 0   ;;  %s1111_s23 = smov 0  }
   0x6 LB: > { %s863_s24 = sadd.s32 4294967295, %s1068_s23   ;;  %s864_s25 = sadd.s32 4294967294, %s1068_s23   ;;  %s1068_s23 = sphi %s1111_s23, %s22_s23   ;;  %s1064_s22 = sphi %s1109_s22, %s1329_s22   ;;  %s1060_s21 = sphi %s1107_s21, %s1328_s21   ;;  %s1056_s20 = sphi %s1105_s20, %s1327_s20   ;;  %s1052_s19 = sphi %s1103_s19, %s1326_s19   ;;  %s1048_s18 = sphi %s1101_s18, %s1325_s18  }
   0x7   : > { %s34_s26 = sadd.s32 1, %s1064_s22  ;;  %s151_s27 = sadd.s32 1, %s1056_s20 }
   0x8   : > { %p36_p0 = scmp.ge.s32.totalorder %s34_s26, 2  ;;  %p161_p1 = scmp.ne.s32.totalorder %s1056_s20, %s1052_s19 }
   0x9   : > { %p162_p2 = scmp.eq.s32.totalorder %s863_s24, 1  ;;  %p167_p3 = scmp.ne.s32.totalorder %s1052_s19, %s1048_s18 }
   0xa   : > { %s1331_s26 = smov (%p36_p0, %s34_s26), 0  ;;  %p168_p5 = scmp.eq.s32.totalorder %s864_s25, 1 }
   0xb   : > { %p1141_p4 = por %p162_p2, %p161_p1  ;;  %s146_s29 = ssub.s32 %s1064_s22, %s1331_s26 }
   0xc   : > { %p867_p6 = scmp.ge.s32.totalorder %s1068_s23, 1  ;;  %p149_p7 = scmp.eq.s32.totalorder %s146_s29, 0 }
   0xd   : > { %p1148_p8 = por %p168_p5, %p167_p3  ;;  %p252_p9 = scmp.lt.s32.totalorder %s1068_s23, 3 }
   0xe   : > { %s1154_s6 = scalar_select %p149_p7, %s1056_s20, %s151_s27  }
   0xf   : > { %p253_p10 = pnand %p867_p6, %p252_p9 }
  0x10   : > { %p306_p11 = scmp.lt.s32.totalorder (!%p253_p10), %s1060_s21, 1 }
  0x11   : > { %256 = sbr.rel (%p253_p10) target bundleno = 448 (0x1c0), region = 36 }
  0x16   : > { %v1070_v0 = vmov 0   ;;  %s1158_s7 = scalar_select %p306_p11, %s1060_s21, 1  ;;  %vm346_vm0 = vcmask 31744   ;;  %vm385_vm1 = vcmask 130048   ;;  %v382_v16 = vlaneseq }
  0x17   : > { %957 = vset.pattern.permute.xlu0 %v1070_v0  ;;  %vm659_vm13 = vcmask 1040384  }
  0x18   : > { %s891_s8 = sshll.u32 %s1158_s7, 3  ;;  %s893_s12 = sshll.u32 %s1158_s7, 4  ;;  %v1173_v19 = vshrl.u32 %v382_v16, 7 }
  0x19   : > { %s313_s11 = scalar_lea.vmem %s1317_s0, %s891_s8  ;;  %s324_s15 = scalar_lea.vmem %s1319_s2, %s893_s12 }
  0x1a   : > { %v895_v1 = vld [vmem:[%s313_s11] sm:$0xff]  ;;  %s319_s24 = scalar_lea.vmem %s1318_s1, %s891_s8  ;;  %v368_v5 = vld [vmem:[%s324_s15 + $0x8] sm:$0xff]  ;;  %s330_s29 = scalar_lea.vmem %s1320_s3, %s1158_s7  ;;  %v1182_v23 = vadd.s32 8, %v1173_v19 }
  0x1b   : > { %v351_v2 = vsel %vm346_vm0, %v895_v1, 0  ;;  %v367_v3 = vld [vmem:[%s324_s15] sm:$0xff]  ;;  %s1243_s7 = sand.u32 1, %s1052_s19   ;;  %s887_s8 = sshll.u32 %s1060_s21, 3 }
  0x1c   : > { %360 = vmatpush.bf16.xpose.msra.mxu0 %v351_v2  ;;  %371 = vperm.xlu0 %957, %v367_v3   ;;  %v894_v4 = vld [vmem:[%s319_s24] sm:$0xff]  ;;  %s868_s9 = sshll.u32 %s1243_s7, 3  ;;  %s699_s12 = scalar_lea.hbm %s1321_s4, %s887_s8 }
  0x1d   : > { %v1179_v22 = vld [vmem:[%s330_s29] sm:$0x1]  ;;  %s297_s13 = scalar_lea.vmem [#allocation2], %s868_s9  ;;  %s703_s15 = sshll.u32 %s699_s12, 4  ;;  %s704_s15 = int_to_ptr.hbm [resolvable:$true] %s703_s15 }
  0x1e   : > { %s701_s14 = sshll.u32 %s297_s13, 4  ;;  %s683_s16 = scalar_lea.sflag [#allocation3], %s1243_s7  ;;  %s702_s14 = int_to_ptr.vmem [resolvable:$true] %s701_s14 }
  0x1f   : > { %s972_s17 = sshra.s32 %s704_s15, 4  ;;  %s978_s29 = scalar_lea.hbm %s1321_s4, 16  ;;  %s973_s17 = int_to_ptr.hbm [resolvable:$true] %s972_s17 }
  0x20   : > { %s974_s24 = scalar_lea.hbm %s973_s17, 8  ;;  %p979_p1 = scmp.lt.s32.totalorder %s973_s17, %s1321_s4 }
  0x21   : > { %p975_p12 = scmp.ne.s32.totalorder %s973_s17, %s974_s24  ;;  %p980_p2 = scmp.lt.s32.totalorder %s978_s29, %s974_s24 }
  0x23   : > { %884 = vmatmul.msk.bf16.vlgmr.msra.gmra.mxu0 %vm346_vm0, %v894_v4  ;;  %p976_p13 = pnand %p975_p12, %p1141_p4  ;;  %p981_p3 = por %p980_p2, %p979_p1 }
  0x24   : > { %376 = vperm.xlu0 %957, %v368_v5  }
  0x25   : > { %p977_p0 = pneg %p976_p13 }
  0x27   : > { %p982_p5 = pnand %p981_p3, %p977_p0 }
  0x8e   : > { %v372_v6 = vpop.permute.xlu0 %371 }
  0x96   : > { %v377_v9 = vpop.permute.xlu0 %376 }
  0xa0   : > { %v362_v7 = vpop.f32.mrf.mxu0 }
  0xa1   : > { %v379_v8 = vsub.f32 %v362_v7, %v372_v6 }
  0xa3   : > { %v386_v12 = vsel %vm385_vm1, %v379_v8, -inf }
  0xa8   : > { %v364_v10 = vpop.f32.mrf.mxu0 }
  0xa9   : > { %v380_v11 = vsub.f32 %v364_v10, %v377_v9 }
  0xab   : > { %v387_v13 = vsel %vm385_vm1, %v380_v11, -inf }
  0xac   : > { %v388_v14 = vmax.f32 %v386_v12, %v387_v13 }
  0xae   : > { %v389_v15 = vrot.slane %v388_v14, 4 }
  0xb0   : > { %v390_v17 = vmax.f32 %v388_v14, %v389_v15 }
  0xb2   : > { %v391_v18 = vrot.slane %v390_v17, 2 }
  0xb4   : > { %v392_v20 = vmax.f32 %v390_v17, %v391_v18 }
  0xb6   : > { %v393_v21 = vrot.slane %v392_v20, 1 }
  0xb8   : > { %v394_v24 = vmax.f32 %v392_v20, %v393_v21 }
  0xba   : > { %vm395_vm2 = vcmp.eq.f32.partialorder %v379_v8, %v394_v24  ;;  %vm396_vm3 = vcmp.eq.f32.partialorder %v380_v11, %v394_v24  ;;  %v412_v25 = vsub.f32 %v394_v24, %v1179_v22 }
  0xbb   : > { %v397_v26 = vsel %vm395_vm2, %v1173_v19, 16  ;;  %v398_v27 = vsel %vm396_vm3, %v1182_v23, 16 }
  0xbc   : > { %v399_v28 = vsel %vm385_vm1, %v397_v26, 2147483647  ;;  %v400_v29 = vsel %vm385_vm1, %v398_v27, 2147483647  ;;  %v413_v54 = vmul.f32 2.0, %v412_v25 }
  0xbd   : > { %vm401_vm4 = vcmp.lt.s32.totalorder %v399_v28, %v400_v29 }
  0xbe   : > { %v402_v30 = vsel %vm401_vm4, %v399_v28, %v400_v29 }
  0xbf   : > { %v403_v31 = vrot.slane %v402_v30, 4 }
  0xc1   : > { %vm404_vm5 = vcmp.lt.s32.totalorder %v402_v30, %v403_v31 }
  0xc2   : > { %v405_v32 = vsel %vm404_vm5, %v402_v30, %v403_v31 }
  0xc3   : > { %v406_v33 = vrot.slane %v405_v32, 2 }
  0xc5   : > { %vm407_vm6 = vcmp.lt.s32.totalorder %v405_v32, %v406_v33 }
  0xc6   : > { %v408_v34 = vsel %vm407_vm6, %v405_v32, %v406_v33 }
  0xc7   : > { %v409_v35 = vrot.slane %v408_v34, 1 }
  0xc9   : > { %vm410_vm7 = vcmp.lt.s32.totalorder %v408_v34, %v409_v35 }
  0xca   : > { %v411_v36 = vsel %vm410_vm7, %v408_v34, %v409_v35  ;;  %vm661_vm7 = vcmask 1041408  }
  0xcb   : > { %vm414_vm8 = vcmp.eq.s32.totalorder %v397_v26, %v411_v36  ;;  %vm415_vm9 = vcmp.eq.s32.totalorder %v398_v27, %v411_v36 }
  0xcc   : > { %v416_v37 = vsel %vm414_vm8, -inf, %v379_v8  ;;  %v417_v38 = vsel %vm415_vm9, -inf, %v380_v11 }
  0xcd   : > { %v418_v39 = vsel %vm385_vm1, %v416_v37, -inf  ;;  %v419_v40 = vsel %vm385_vm1, %v417_v38, -inf }
  0xce   : > { %v420_v41 = vmax.f32 %v418_v39, %v419_v40 }
  0xd0   : > { %v421_v42 = vrot.slane %v420_v41, 4 }
  0xd2   : > { %v422_v43 = vmax.f32 %v420_v41, %v421_v42 }
  0xd4   : > { %v423_v44 = vrot.slane %v422_v43, 2 }
  0xd6   : > { %v424_v45 = vmax.f32 %v422_v43, %v423_v44 }
  0xd8   : > { %v425_v46 = vrot.slane %v424_v45, 1 }
  0xda   : > { %v426_v47 = vmax.f32 %v424_v45, %v425_v46 }
  0xdc   : > { %vm427_vm10 = vcmp.eq.f32.partialorder %v416_v37, %v426_v47  ;;  %vm428_vm11 = vcmp.eq.f32.partialorder %v417_v38, %v426_v47  ;;  %v444_v48 = vsub.f32 %v426_v47, %v1179_v22 }
  0xdd   : > { %v429_v49 = vsel %vm427_vm10, %v1173_v19, 16  ;;  %v430_v50 = vsel %vm428_vm11, %v1182_v23, 16 }
  0xde   : > { %v431_v51 = vsel %vm385_vm1, %v429_v49, 2147483647  ;;  %v432_v52 = vsel %vm385_vm1, %v430_v50, 2147483647  ;;  %v445_v53 = vmul.f32 2.0, %v444_v48 }
  0xdf   : > { %vm433_vm12 = vcmp.lt.s32.totalorder %v431_v51, %v432_v52 }
  0xe0   : > { %v434_v55 = vsel %vm433_vm12, %v431_v51, %v432_v52  ;;  %v639_v56 = vrot.slane %v445_v53, 7 }
  0xe1   : > { %v435_v57 = vrot.slane %v434_v55, 4 }
  0xe2   : > { %v660_v58 = vsel %vm659_vm13, %v413_v54, %v639_v56 }
  0xe3   : > { %vm436_vm14 = vcmp.lt.s32.totalorder %v434_v55, %v435_v57 }
  0xe4   : > { %v437_v59 = vsel %vm436_vm14, %v434_v55, %v435_v57 }
  0xe5   : > { %v438_v60 = vrot.slane %v437_v59, 2 }
  0xe7   : > { %vm439_vm15 = vcmp.lt.s32.totalorder %v437_v59, %v438_v60 }
  0xe8   : > { %v440_v61 = vsel %vm439_vm15, %v437_v59, %v438_v60 }
  0xe9   : > { %v441_v62 = vrot.slane %v440_v61, 1 }
  0xeb   : > { %vm442_vm0 = vcmp.lt.s32.totalorder %v440_v61, %v441_v62 }
  0xec   : > { %v443_v63 = vsel %vm442_vm0, %v440_v61, %v441_v62  ;;  %vm663_vm0 = vcmask 1042432  }
  0xed   : > { %vm446_vm2 = vcmp.eq.s32.totalorder %v429_v49, %v443_v63  ;;  %vm447_vm3 = vcmp.eq.s32.totalorder %v430_v50, %v443_v63  ;;  %v674_v0 = vsel %vm659_vm13, %v411_v36, %v443_v63 }
  0xee   : > { %v448_v1 = vsel %vm446_vm2, -inf, %v416_v37  ;;  %v449_v2 = vsel %vm447_vm3, -inf, %v417_v38 }
  0xef   : > { %v450_v3 = vsel %vm385_vm1, %v448_v1, -inf  ;;  %v451_v4 = vsel %vm385_vm1, %v449_v2, -inf }
  0xf0   : > { %v452_v5 = vmax.f32 %v450_v3, %v451_v4 }
  0xf2   : > { %v453_v6 = vrot.slane %v452_v5, 4 }
  0xf4   : > { %v454_v7 = vmax.f32 %v452_v5, %v453_v6 }
  0xf6   : > { %v455_v8 = vrot.slane %v454_v7, 2 }
  0xf8   : > { %v456_v9 = vmax.f32 %v454_v7, %v455_v8 }
  0xfa   : > { %v457_v10 = vrot.slane %v456_v9, 1 }
  0xfc   : > { %v458_v11 = vmax.f32 %v456_v9, %v457_v10 }
  0xfe   : > { %vm459_vm4 = vcmp.eq.f32.partialorder %v448_v1, %v458_v11  ;;  %vm460_vm5 = vcmp.eq.f32.partialorder %v449_v2, %v458_v11  ;;  %v476_v12 = vsub.f32 %v458_v11, %v1179_v22 }
  0xff   : > { %v461_v13 = vsel %vm459_vm4, %v1173_v19, 16  ;;  %v462_v14 = vsel %vm460_vm5, %v1182_v23, 16 }
 0x100   : > { %v463_v15 = vsel %vm385_vm1, %v461_v13, 2147483647  ;;  %v464_v16 = vsel %vm385_vm1, %v462_v14, 2147483647  ;;  %v477_v17 = vmul.f32 2.0, %v476_v12 }
 0x101   : > { %vm465_vm6 = vcmp.lt.s32.totalorder %v463_v15, %v464_v16 }
 0x102   : > { %v466_v18 = vsel %vm465_vm6, %v463_v15, %v464_v16  ;;  %v642_v20 = vrot.slane %v477_v17, 6 }
 0x103   : > { %v467_v21 = vrot.slane %v466_v18, 4 }
 0x104   : > { %v662_v24 = vsel %vm661_vm7, %v660_v58, %v642_v20 }
 0x105   : > { %vm468_vm8 = vcmp.lt.s32.totalorder %v466_v18, %v467_v21 }
 0x106   : > { %v469_v25 = vsel %vm468_vm8, %v466_v18, %v467_v21 }
 0x107   : > { %v470_v26 = vrot.slane %v469_v25, 2 }
 0x109   : > { %vm471_vm9 = vcmp.lt.s32.totalorder %v469_v25, %v470_v26 }
 0x10a   : > { %v472_v27 = vsel %vm471_vm9, %v469_v25, %v470_v26 }
 0x10b   : > { %v473_v28 = vrot.slane %v472_v27, 1 }
 0x10d   : > { %vm474_vm10 = vcmp.lt.s32.totalorder %v472_v27, %v473_v28 }
 0x10e   : > { %v475_v29 = vsel %vm474_vm10, %v472_v27, %v473_v28  ;;  %vm665_vm10 = vcmask 1043456  }
 0x10f   : > { %vm478_vm11 = vcmp.eq.s32.totalorder %v461_v13, %v475_v29  ;;  %vm479_vm12 = vcmp.eq.s32.totalorder %v462_v14, %v475_v29  ;;  %v675_v30 = vsel %vm661_vm7, %v674_v0, %v475_v29 }
 0x110   : > { %v480_v31 = vsel %vm478_vm11, -inf, %v448_v1  ;;  %v481_v32 = vsel %vm479_vm12, -inf, %v449_v2 }
 0x111   : > { %v482_v33 = vsel %vm385_vm1, %v480_v31, -inf  ;;  %v483_v34 = vsel %vm385_vm1, %v481_v32, -inf }
 0x112   : > { %v484_v35 = vmax.f32 %v482_v33, %v483_v34 }
 0x114   : > { %v485_v36 = vrot.slane %v484_v35, 4 }
 0x116   : > { %v486_v37 = vmax.f32 %v484_v35, %v485_v36 }
 0x118   : > { %v487_v38 = vrot.slane %v486_v37, 2 }
 0x11a   : > { %v488_v39 = vmax.f32 %v486_v37, %v487_v38 }
 0x11c   : > { %v489_v40 = vrot.slane %v488_v39, 1 }
 0x11e   : > { %v490_v41 = vmax.f32 %v488_v39, %v489_v40 }
 0x120   : > { %vm491_vm13 = vcmp.eq.f32.partialorder %v480_v31, %v490_v41  ;;  %vm492_vm14 = vcmp.eq.f32.partialorder %v481_v32, %v490_v41  ;;  %v508_v42 = vsub.f32 %v490_v41, %v1179_v22 }
 0x121   : > { %v493_v43 = vsel %vm491_vm13, %v1173_v19, 16  ;;  %v494_v44 = vsel %vm492_vm14, %v1182_v23, 16 }
 0x122   : > { %v495_v45 = vsel %vm385_vm1, %v493_v43, 2147483647  ;;  %v496_v46 = vsel %vm385_vm1, %v494_v44, 2147483647  ;;  %v509_v47 = vmul.f32 2.0, %v508_v42 }
 0x123   : > { %vm497_vm15 = vcmp.lt.s32.totalorder %v495_v45, %v496_v46 }
 0x124   : > { %v498_v48 = vsel %vm497_vm15, %v495_v45, %v496_v46  ;;  %v645_v49 = vrot.slane %v509_v47, 5 }
 0x125   : > { %v499_v50 = vrot.slane %v498_v48, 4 }
 0x126   : > { %v664_v51 = vsel %vm663_vm0, %v662_v24, %v645_v49 }
 0x127   : > { %vm500_vm2 = vcmp.lt.s32.totalorder %v498_v48, %v499_v50 }
 0x128   : > { %v501_v52 = vsel %vm500_vm2, %v498_v48, %v499_v50 }
 0x129   : > { %v502_v53 = vrot.slane %v501_v52, 2 }
 0x12b   : > { %vm503_vm3 = vcmp.lt.s32.totalorder %v501_v52, %v502_v53 }
 0x12c   : > { %v504_v54 = vsel %vm503_vm3, %v501_v52, %v502_v53 }
 0x12d   : > { %v505_v55 = vrot.slane %v504_v54, 1 }
 0x12f   : > { %vm506_vm4 = vcmp.lt.s32.totalorder %v504_v54, %v505_v55 }
 0x130   : > { %v507_v56 = vsel %vm506_vm4, %v504_v54, %v505_v55  ;;  %vm667_vm4 = vcmask 1044480  }
 0x131   : > { %vm510_vm5 = vcmp.eq.s32.totalorder %v493_v43, %v507_v56  ;;  %vm511_vm6 = vcmp.eq.s32.totalorder %v494_v44, %v507_v56  ;;  %v676_v57 = vsel %vm663_vm0, %v675_v30, %v507_v56 }
 0x132   : > { %v512_v58 = vsel %vm510_vm5, -inf, %v480_v31  ;;  %v513_v59 = vsel %vm511_vm6, -inf, %v481_v32 }
 0x133   : > { %v514_v60 = vsel %vm385_vm1, %v512_v58, -inf  ;;  %v515_v61 = vsel %vm385_vm1, %v513_v59, -inf }
 0x134   : > { %v516_v62 = vmax.f32 %v514_v60, %v515_v61 }
 0x136   : > { %v517_v63 = vrot.slane %v516_v62, 4 }
 0x138   : > { %v518_v0 = vmax.f32 %v516_v62, %v517_v63 }
 0x13a   : > { %v519_v1 = vrot.slane %v518_v0, 2 }
 0x13c   : > { %v520_v2 = vmax.f32 %v518_v0, %v519_v1 }
 0x13e   : > { %v521_v3 = vrot.slane %v520_v2, 1 }
 0x140   : > { %v522_v4 = vmax.f32 %v520_v2, %v521_v3 }
 0x142   : > { %vm523_vm7 = vcmp.eq.f32.partialorder %v512_v58, %v522_v4  ;;  %vm524_vm8 = vcmp.eq.f32.partialorder %v513_v59, %v522_v4  ;;  %v540_v5 = vsub.f32 %v522_v4, %v1179_v22 }
 0x143   : > { %v525_v6 = vsel %vm523_vm7, %v1173_v19, 16  ;;  %v526_v7 = vsel %vm524_vm8, %v1182_v23, 16 }
 0x144   : > { %v527_v8 = vsel %vm385_vm1, %v525_v6, 2147483647  ;;  %v528_v9 = vsel %vm385_vm1, %v526_v7, 2147483647  ;;  %v541_v10 = vmul.f32 2.0, %v540_v5 }
 0x145   : > { %vm529_vm9 = vcmp.lt.s32.totalorder %v527_v8, %v528_v9 }
 0x146   : > { %v530_v11 = vsel %vm529_vm9, %v527_v8, %v528_v9  ;;  %v648_v12 = vrot.slane %v541_v10, 4 }
 0x147   : > { %v531_v13 = vrot.slane %v530_v11, 4 }
 0x148   : > { %v666_v14 = vsel %vm665_vm10, %v664_v51, %v648_v12 }
 0x149   : > { %vm532_vm11 = vcmp.lt.s32.totalorder %v530_v11, %v531_v13 }
 0x14a   : > { %v533_v15 = vsel %vm532_vm11, %v530_v11, %v531_v13 }
 0x14b   : > { %v534_v16 = vrot.slane %v533_v15, 2 }
 0x14d   : > { %vm535_vm12 = vcmp.lt.s32.totalorder %v533_v15, %v534_v16 }
 0x14e   : > { %v536_v17 = vsel %vm535_vm12, %v533_v15, %v534_v16 }
 0x14f   : > { %v537_v18 = vrot.slane %v536_v17, 1 }
 0x151   : > { %vm538_vm13 = vcmp.lt.s32.totalorder %v536_v17, %v537_v18 }
 0x152   : > { %v539_v20 = vsel %vm538_vm13, %v536_v17, %v537_v18  ;;  %vm669_vm13 = vcmask 1045504  }
 0x153   : > { %vm542_vm14 = vcmp.eq.s32.totalorder %v525_v6, %v539_v20  ;;  %vm543_vm15 = vcmp.eq.s32.totalorder %v526_v7, %v539_v20  ;;  %v677_v21 = vsel %vm665_vm10, %v676_v57, %v539_v20 }
 0x154   : > { %v544_v24 = vsel %vm542_vm14, -inf, %v512_v58  ;;  %v545_v25 = vsel %vm543_vm15, -inf, %v513_v59 }
 0x155   : > { %v546_v26 = vsel %vm385_vm1, %v544_v24, -inf  ;;  %v547_v27 = vsel %vm385_vm1, %v545_v25, -inf }
 0x156   : > { %v548_v28 = vmax.f32 %v546_v26, %v547_v27 }
 0x158   : > { %v549_v29 = vrot.slane %v548_v28, 4 }
 0x15a   : > { %v550_v30 = vmax.f32 %v548_v28, %v549_v29 }
 0x15c   : > { %v551_v31 = vrot.slane %v550_v30, 2 }
 0x15e   : > { %v552_v32 = vmax.f32 %v550_v30, %v551_v31 }
 0x160   : > { %v553_v33 = vrot.slane %v552_v32, 1 }
 0x162   : > { %v554_v34 = vmax.f32 %v552_v32, %v553_v33 }
 0x164   : > { %vm555_vm0 = vcmp.eq.f32.partialorder %v544_v24, %v554_v34  ;;  %vm556_vm2 = vcmp.eq.f32.partialorder %v545_v25, %v554_v34  ;;  %v572_v35 = vsub.f32 %v554_v34, %v1179_v22 }
 0x165   : > { %v557_v36 = vsel %vm555_vm0, %v1173_v19, 16  ;;  %v558_v37 = vsel %vm556_vm2, %v1182_v23, 16 }
 0x166   : > { %v559_v38 = vsel %vm385_vm1, %v557_v36, 2147483647  ;;  %v560_v39 = vsel %vm385_vm1, %v558_v37, 2147483647  ;;  %v573_v40 = vmul.f32 2.0, %v572_v35 }
 0x167   : > { %vm561_vm3 = vcmp.lt.s32.totalorder %v559_v38, %v560_v39 }
 0x168   : > { %v562_v41 = vsel %vm561_vm3, %v559_v38, %v560_v39  ;;  %v651_v42 = vrot.slane %v573_v40, 3 }
 0x169   : > { %v563_v43 = vrot.slane %v562_v41, 4 }
 0x16a   : > { %v668_v44 = vsel %vm667_vm4, %v666_v14, %v651_v42 }
 0x16b   : > { %vm564_vm5 = vcmp.lt.s32.totalorder %v562_v41, %v563_v43 }
 0x16c   : > { %v565_v45 = vsel %vm564_vm5, %v562_v41, %v563_v43 }
 0x16d   : > { %v566_v46 = vrot.slane %v565_v45, 2 }
 0x16f   : > { %vm567_vm6 = vcmp.lt.s32.totalorder %v565_v45, %v566_v46 }
 0x170   : > { %v568_v47 = vsel %vm567_vm6, %v565_v45, %v566_v46  ;;  %vm671_vm6 = vcmask 1046528  }
 0x171   : > { %v569_v48 = vrot.slane %v568_v47, 1 }
 0x173   : > { %vm570_vm7 = vcmp.lt.s32.totalorder %v568_v47, %v569_v48 }
 0x174   : > { %v571_v49 = vsel %vm570_vm7, %v568_v47, %v569_v48 }
 0x175   : > { %vm574_vm8 = vcmp.eq.s32.totalorder %v557_v36, %v571_v49  ;;  %vm575_vm9 = vcmp.eq.s32.totalorder %v558_v37, %v571_v49  ;;  %v1226_v50 = vsel %vm667_vm4, %v677_v21, %v571_v49 }
 0x176   : > { %v576_v51 = vsel %vm574_vm8, -inf, %v544_v24  ;;  %v577_v52 = vsel %vm575_vm9, -inf, %v545_v25 }
 0x177   : > { %v578_v53 = vsel %vm385_vm1, %v576_v51, -inf  ;;  %v579_v54 = vsel %vm385_vm1, %v577_v52, -inf }
 0x178   : > { %v580_v55 = vmax.f32 %v578_v53, %v579_v54 }
 0x17a   : > { %v581_v56 = vrot.slane %v580_v55, 4 }
 0x17c   : > { %v582_v57 = vmax.f32 %v580_v55, %v581_v56 }
 0x17e   : > { %v583_v58 = vrot.slane %v582_v57, 2 }
 0x180   : > { %v584_v59 = vmax.f32 %v582_v57, %v583_v58 }
 0x182   : > { %v585_v60 = vrot.slane %v584_v59, 1 }
 0x184   : > { %v586_v61 = vmax.f32 %v584_v59, %v585_v60 }
 0x186   : > { %vm587_vm10 = vcmp.eq.f32.partialorder %v576_v51, %v586_v61  ;;  %vm588_vm11 = vcmp.eq.f32.partialorder %v577_v52, %v586_v61  ;;  %v604_v62 = vsub.f32 %v586_v61, %v1179_v22 }
 0x187   : > { %v589_v63 = vsel %vm587_vm10, %v1173_v19, 16  ;;  %v590_v0 = vsel %vm588_vm11, %v1182_v23, 16 }
 0x188   : > { %v591_v1 = vsel %vm385_vm1, %v589_v63, 2147483647  ;;  %v592_v2 = vsel %vm385_vm1, %v590_v0, 2147483647  ;;  %v605_v3 = vmul.f32 2.0, %v604_v62 }
 0x189   : > { %vm593_vm12 = vcmp.lt.s32.totalorder %v591_v1, %v592_v2 }
 0x18a   : > { %v594_v4 = vsel %vm593_vm12, %v591_v1, %v592_v2  ;;  %v654_v5 = vrot.slane %v605_v3, 2 }
 0x18b   : > { %v595_v6 = vrot.slane %v594_v4, 4 }
 0x18c   : > { %v670_v7 = vsel %vm669_vm13, %v668_v44, %v654_v5 }
 0x18d   : > { %vm596_vm14 = vcmp.lt.s32.totalorder %v594_v4, %v595_v6 }
 0x18e   : > { %v597_v8 = vsel %vm596_vm14, %v594_v4, %v595_v6 }
 0x18f   : > { %v598_v9 = vrot.slane %v597_v8, 2 }
 0x191   : > { %vm599_vm15 = vcmp.lt.s32.totalorder %v597_v8, %v598_v9 }
 0x192   : > { %v600_v10 = vsel %vm599_vm15, %v597_v8, %v598_v9 }
 0x193   : > { %v601_v11 = vrot.slane %v600_v10, 1 }
 0x195   : > { %vm602_vm0 = vcmp.lt.s32.totalorder %v600_v10, %v601_v11 }
 0x196   : > { %v1236_v12 = vsel %vm602_vm0, %v600_v10, %v601_v11 }
 0x197   : > { %vm606_vm2 = vcmp.eq.s32.totalorder %v589_v63, %v1236_v12  ;;  %vm607_vm3 = vcmp.eq.s32.totalorder %v590_v0, %v1236_v12 }
 0x198   : > { %v608_v13 = vsel %vm606_vm2, -inf, %v576_v51  ;;  %v609_v14 = vsel %vm607_vm3, -inf, %v577_v52 }
 0x199   : > { %v610_v15 = vsel %vm385_vm1, %v608_v13, -inf  ;;  %v611_v16 = vsel %vm385_vm1, %v609_v14, -inf }
 0x19a   : > { %v612_v17 = vmax.f32 %v610_v15, %v611_v16 }
 0x19c   : > { %v613_v18 = vrot.slane %v612_v17, 4 }
 0x19e   : > { %v614_v20 = vmax.f32 %v612_v17, %v613_v18 }
 0x1a0   : > { %v615_v21 = vrot.slane %v614_v20, 2 }
 0x1a2   : > { %v616_v24 = vmax.f32 %v614_v20, %v615_v21 }
 0x1a4   : > { %v617_v25 = vrot.slane %v616_v24, 1 }
 0x1a6   : > { %v618_v26 = vmax.f32 %v616_v24, %v617_v25 }
 0x1a8   : > { %v636_v27 = vsub.f32 %v618_v26, %v1179_v22  ;;  %vm619_vm4 = vcmp.eq.f32.partialorder %v608_v13, %v618_v26  ;;  %vm620_vm5 = vcmp.eq.f32.partialorder %v609_v14, %v618_v26 }
 0x1a9   : > { %v621_v28 = vsel %vm619_vm4, %v1173_v19, 16  ;;  %v622_v29 = vsel %vm620_vm5, %v1182_v23, 16 }
 0x1aa   : > { %v637_v30 = vmul.f32 2.0, %v636_v27  ;;  %v623_v31 = vsel %vm385_vm1, %v621_v28, 2147483647  ;;  %v624_v32 = vsel %vm385_vm1, %v622_v29, 2147483647 }
 0x1ab   : > { %vm625_vm7 = vcmp.lt.s32.totalorder %v623_v31, %v624_v32 }
 0x1ac   : > { %v657_v22 = vrot.slane %v637_v30, 1  ;;  %v626_v33 = vsel %vm625_vm7, %v623_v31, %v624_v32 }
 0x1ad   : > { %v627_v34 = vrot.slane %v626_v33, 4 }
 0x1ae   : > { %v672_v35 = vsel %vm671_vm6, %v670_v7, %v657_v22 }
 0x1af   : > { %673 = vst.msk [vmem:[%s297_s13] sm:$0xff] %vm385_vm1, %v672_v35  ;;  %vm628_vm8 = vcmp.lt.s32.totalorder %v626_v33, %v627_v34 }
 0x1b0   : > { %985 = shalt.err (!%p982_p5)
}
 0x1b1   : > { %896 = dma.vmem_to_hbm [thread:$0]  (%p1141_p4), %s702_s14, 128, %s704_s15, %s683_s16   ;;  %v629_v19 = vsel %vm628_vm8, %v626_v33, %v627_v34  ;;  %v679_v39 = vsel %vm669_vm13, %v1226_v50, %v1236_v12 }
 0x1b2   : > { %v630_v23 = vrot.slane %v629_v19, 2  ;;  %s714_s25 = scalar_lea.hbm %s1322_s5, %s887_s8  ;;  %s304_s17 = scalar_lea.vmem [#allocation4], %s868_s9 }
 0x1b3   : > { %s716_s24 = sshll.u32 %s304_s17, 4  ;;  %s718_s27 = sshll.u32 %s714_s25, 4  ;;  %s717_s24 = int_to_ptr.vmem [resolvable:$true] %s716_s24  ;;  %s719_s27 = int_to_ptr.hbm [resolvable:$true] %s718_s27 }
 0x1b4   : > { %vm631_vm9 = vcmp.lt.s32.totalorder %v629_v19, %v630_v23  ;;  %s688_s21 = scalar_lea.sflag [#allocation5], %s1243_s7  ;;  %s1000_s8 = sshra.s32 %s719_s27, 4  ;;  %s1001_s8 = int_to_ptr.hbm [resolvable:$true] %s1000_s8 }
 0x1b5   : > { %v632_v36 = vsel %vm631_vm9, %v629_v19, %v630_v23  ;;  %s1002_s14 = scalar_lea.hbm %s1001_s8, 8  ;;  %s1006_s16 = scalar_lea.hbm %s1322_s5, 16 }
 0x1b6   : > { %v633_v37 = vrot.slane %v632_v36, 1  ;;  %p1003_p6 = scmp.ne.s32.totalorder %s1001_s8, %s1002_s14  ;;  %p1007_p10 = scmp.lt.s32.totalorder %s1001_s8, %s1322_s5 }
 0x1b7   : > { %p1008_p11 = scmp.lt.s32.totalorder %s1006_s16, %s1002_s14 }
 0x1b8   : > { %vm634_vm10 = vcmp.lt.s32.totalorder %v632_v36, %v633_v37  ;;  %p1004_p7 = pnand %p1003_p6, %p1141_p4 }
 0x1b9   : > { %v635_v38 = vsel %vm634_vm10, %v632_v36, %v633_v37  ;;  %p1009_p12 = por %p1008_p11, %p1007_p10 }
 0x1ba   : > { %v680_v40 = vsel %vm671_vm6, %v679_v39, %v635_v38  ;;  %p1005_p9 = pneg %p1004_p7 }
 0x1bb   : > { %681 = vst.msk [vmem:[%s304_s17] sm:$0xff] %vm385_vm1, %v680_v40 }
 0x1bc   : > { %p1010_p13 = pnand %p1009_p12, %p1005_p9 }
 0x1be   : > { %1013 = shalt.err (!%p1010_p13)
}
 0x1bf   : > { %897 = dma.vmem_to_hbm [thread:$0]  (%p1141_p4), %s717_s24, 128, %s719_s27, %s688_s21  }
 0x1c0 PF: > { %p907_p0 = scmp.ge.s32.totalorder %s1068_s23, 2  ;;  %s730_s7 = sand.u32 1, %s1048_s18  }
 0x1c1   : > { %s731_s11 = scalar_lea.sflag [#allocation3], %s730_s7 }
 0x1c2   : > { %p901_p1 = pnand %p907_p0, %p1148_p8 }
 0x1c4   : > { %p902_p2 = pneg %p901_p1 }
 0x1c6   : > { %1039 = dma.done.wait (%p902_p2), %s731_s11, 128  }
 0x1c7   : > { %1041 = vsyncadd (%p902_p2), %s731_s11, 4294967168  ;;  %s741_s12 = scalar_lea.sflag [#allocation5], %s730_s7 }
 0x1c8   : > { %1043 = dma.done.wait (%p902_p2), %s741_s12, 128  }
 0x1c9   : > { %1045 = vsyncadd (%p902_p2), %s741_s12, 4294967168  ;;  %s22_s23 = sadd.s32 1, %s1068_s23   ;;  %s1325_s18 = smov %s1052_s19 }
 0x1ca   : > { %p19_p3 = scmp.ge.s32.totalorder %s22_s23, 4   ;;  %s1326_s19 = smov %s1056_s20 }
 0x1cb   : > { %s1327_s20 = smov %s1154_s6  ;;  %s1328_s21 = smov %s1064_s22 }
 0x1cc   : > { %s1329_s22 = smov %s1331_s26  ;;  %21 = sbr.rel (!%p19_p3) target bundleno = 6 (0x6), region = 97 }
 0x1d1   :  { %747 = vsyncpa [#allocation3], 1 }
 0x1d2   :  { %749 = vsyncpa [#allocation3 + $0x1], 1 }
 0x1d3   :  { %750 = vsyncpa [#allocation5], 1 }
 0x1d4   :  { %752 = vsyncpa [#allocation5 + $0x1], 1 }

</bundles_post_ra>
